<compile_context>
chip_gen: v7x
topology: tpu7x:2x2x1
jax: 0.10.0
libtpu: 0.0.40
codegen_flags: <defaults>
</compile_context>

<pallas_src>
import jax
import jax.numpy as jnp
from jax.experimental import pallas as pl
from jax.experimental.pallas import tpu as pltpu


def _round_up(x, m):
    return (x + m - 1) // m * m


def _cdiv(a, b):
    return -(-a // b)


def patch_embedding_prepare(weight, bias, *, compute_dtype=jnp.bfloat16):
    """One-time parameter prep (hoisted out of the per-call path).

    weight: (embedding_dim, input_dim) PyTorch nn.Linear layout.
    bias:   (embedding_dim,)
    Returns (w_t, b_row): pre-transposed, pre-cast (K, E) weight and (1, E) f32 bias.
    """
    E, K = weight.shape
    assert bias.shape == (E,)
    w_t = jnp.asarray(weight).T.astype(compute_dtype)      # (K, E)
    b_row = jnp.asarray(bias).reshape(1, E).astype(jnp.float32)
    return w_t, b_row


def patch_embedding(x_nchw, w_t, b_row, *, out_dtype=None,
                    tm_max=256, tn_max=2048, tk_max=None):
    """PyTorch PatchEmbedding.forward: x.view(B, C, -1) @ weight.T + bias.

    x_nchw: (B, C, H, W) in its native dtype (cast to the weight dtype in-kernel).
    w_t:    (K, E) prepared weight (see patch_embedding_prepare), K = H*W.
    b_row:  (1, E) f32 bias.
    Returns (B, C, E) in out_dtype (default: x's dtype).
    """
    B, C, H, W = x_nchw.shape
    K = H * W
    K_w, E = w_t.shape
    assert K_w == K, "input_dim (= H*W) must match the prepared weight's in_features"
    assert b_row.shape == (1, E)

    compute_dtype = w_t.dtype
    if out_dtype is None:
        out_dtype = x_nchw.dtype
    M = B * C
    x2d = x_nchw.reshape(M, K)                      # view-style reshape, no cast

    x_bytes = jnp.dtype(x2d.dtype).itemsize
    w_bytes = jnp.dtype(compute_dtype).itemsize
    o_bytes = jnp.dtype(out_dtype).itemsize

    # ---- generation-aware VMEM budget (64 MiB per TC on v7x, 128 MiB v5e/v6e) ----
    try:
        vmem_cap = pltpu.get_tpu_info().vmem_capacity_bytes
    except Exception:
        vmem_cap = 64 << 20                          # conservative fallback
    budget = int(0.6 * vmem_cap)

    # ---- tm: tight around M (f32 input block -> sublane multiple of 8) ----
    n_m_blocks = _cdiv(M, tm_max)
    tm = min(_round_up(_cdiv(M, n_m_blocks), 8), _round_up(M, 8))
    grid_m = _cdiv(M, tm)

    # ---- tn: prefer the full embedding width (one contiguous weight stream) ----
    tn = E if E <= tn_max else (tn_max // 128) * 128
    grid_n = _cdiv(E, tn)

    # ---- tk: as big as the VMEM budget allows; prefer an exact divisor of K ----
    if tk_max is None:
        per_k = 2 * tn * w_bytes + 2 * tm * x_bytes          # bytes per unit of tk
        resid = 2 * tm * tn * o_bytes + tm * tn * 4 + 2 * tn * 4
        tk_max = max(((budget - resid) // max(per_k, 1)) // 128 * 128, 512)
        tk_max = min(tk_max, 8192)
    if K <= tk_max:
        tk, K_pad = K, K
    else:
        tk = None
        for cand in range((min(tk_max, K) // 128) * 128, 127, -128):
            if K % cand == 0:
                tk = cand
                break
        if tk is None:
            tk = max((tk_max // 128) * 128, 128)
        K_pad = _round_up(K, tk)
    grid_k = K_pad // tk

    # ---- keep >=2 parallel blocks so a v7x megacore can use both TensorCores ----
    if grid_m * grid_n < 2 and tn % 256 == 0:
        tn //= 2
        grid_n = _cdiv(E, tn)

    # ---- zero-pad only along K, and only when no exact tk was found ----
    w_in = w_t
    if K_pad != K:
        x2d = jnp.pad(x2d, ((0, 0), (0, K_pad - K)))
        w_in = jnp.pad(w_t, ((0, K_pad - K), (0, 0)))

    # ---- VMEM accounting for the scoped limit ----
    vmem_needed = (2 * tm * tk * x_bytes + 2 * tk * tn * w_bytes
                   + 2 * tm * tn * o_bytes + 2 * tn * 4)
    if grid_k > 1:
        vmem_needed += tm * tn * 4
    vmem_limit = min(max(vmem_needed + (4 << 20), 16 << 20), int(0.9 * vmem_cap))

    cost = pl.CostEstimate(
        flops=2 * M * K * E,
        transcendentals=0,
        bytes_accessed=(M * K_pad * x_bytes + K_pad * E * w_bytes
                        + M * E * o_bytes + E * 4),
    )

    if grid_k == 1:
        # Fast path: whole reduction in one dot; no accumulator scratch, no pl.when.
        def kernel(x_ref, w_ref, b_ref, o_ref):
            x = x_ref[...].astype(compute_dtype)              # in-kernel cast
            acc = jnp.dot(x, w_ref[...], preferred_element_type=jnp.float32)
            o_ref[...] = (acc + b_ref[...]).astype(o_ref.dtype)

        grid = (grid_m, grid_n)
        in_specs = [
            pl.BlockSpec((tm, tk), lambda i, j: (i, 0)),      # x rows (native dtype)
            pl.BlockSpec((tk, tn), lambda i, j: (0, j)),      # weight tile (bf16)
            pl.BlockSpec((1, tn), lambda i, j: (0, j)),       # bias tile (f32)
        ]
        out_specs = pl.BlockSpec((tm, tn), lambda i, j: (i, j))
        scratch_shapes = []
        dim_sem = ("parallel", "parallel")
    else:
        def kernel(x_ref, w_ref, b_ref, o_ref, acc_ref):
            k = pl.program_id(2)

            @pl.when(k == 0)
            def _():
                acc_ref[...] = jnp.zeros_like(acc_ref)

            x = x_ref[...].astype(compute_dtype)              # in-kernel cast
            acc_ref[...] += jnp.dot(x, w_ref[...],
                                    preferred_element_type=jnp.float32)

            @pl.when(k == pl.num_programs(2) - 1)
            def _():
                o_ref[...] = (acc_ref[...] + b_ref[...]).astype(o_ref.dtype)

        grid = (grid_m, grid_n, grid_k)
        in_specs = [
            pl.BlockSpec((tm, tk), lambda i, j, k: (i, k)),
            pl.BlockSpec((tk, tn), lambda i, j, k: (k, j)),
            pl.BlockSpec((1, tn), lambda i, j, k: (0, j)),
        ]
        out_specs = pl.BlockSpec((tm, tn), lambda i, j, k: (i, j))
        scratch_shapes = [pltpu.VMEM((tm, tn), jnp.float32)]
        dim_sem = ("parallel", "parallel", "arbitrary")

    out2d = pl.pallas_call(
        kernel,
        out_shape=jax.ShapeDtypeStruct((M, E), out_dtype),
        grid_spec=pltpu.PrefetchScalarGridSpec(
            num_scalar_prefetch=0,
            grid=grid,
            in_specs=in_specs,
            out_specs=out_specs,
            scratch_shapes=scratch_shapes,
        ),
        compiler_params=pltpu.CompilerParams(
            dimension_semantics=dim_sem,
            vmem_limit_bytes=vmem_limit,
        ),
        cost_estimate=cost,
    )(x2d, w_in, b_row)

    return out2d.reshape(B, C, E)


if __name__ == "__main__":
    # Small shapes consistent with the module's forward:
    #   x: (B, C, H, W) with H*W == input_dim ; projection: input_dim -> embedding_dim
    B, C, H, W = 2, 4, 16, 16
    input_dim = H * W            # 256
    embedding_dim = 512          # matches the module's embedding_dim

    key = jax.random.PRNGKey(0)
    kx, kw, kb = jax.random.split(key, 3)

    x = jax.random.normal(kx, (B, C, H, W), dtype=jnp.float32)
    # Deterministic "Linear" params in PyTorch layout (out_features, in_features).
    bound = 1.0 / (input_dim ** 0.5)
    weight = jax.random.uniform(kw, (embedding_dim, input_dim),
                                minval=-bound, maxval=bound, dtype=jnp.float32)
    bias = jax.random.uniform(kb, (embedding_dim,),
                              minval=-bound, maxval=bound, dtype=jnp.float32)

    # One-time parameter prep (transpose + bf16 cast hoisted out of the call path).
    w_t, b_row = patch_embedding_prepare(weight, bias)

    out = patch_embedding(x, w_t, b_row)
    out = jax.block_until_ready(out)
    assert out.shape == (B, C, embedding_dim)

    x2d = x.reshape(B * C, -1)
    # Reference with matching bf16-operand / f32-accumulate numerics.
    ref_bf16 = (jnp.dot(x2d.astype(jnp.bfloat16), weight.T.astype(jnp.bfloat16),
                        preferred_element_type=jnp.float32)
                + bias).reshape(B, C, embedding_dim)
    assert jnp.allclose(out, ref_bf16, atol=2e-3, rtol=2e-3)

    # Looser sanity check against the full-f32 PyTorch semantics.
    # NOTE: bf16 operands are a deliberate design choice; error grows with K = H*W.
    ref_f32 = (x2d @ weight.T + bias).reshape(B, C, embedding_dim)
    assert jnp.allclose(out, ref_f32, atol=5e-2, rtol=5e-2)

    print("KERNEL_OK")
</pallas_src>

<mosaic_0001>
module attributes {stable_mosaic.version = 11 : i64} {
  func.func @kernel(%arg0: i32, %arg1: i32, %arg2: memref<8x256xf32, #tpu.memory_space<vmem>>, %arg3: memref<256x256xbf16, #tpu.memory_space<vmem>>, %arg4: memref<1x256xf32, #tpu.memory_space<vmem>>, %arg5: memref<8x256xf32, #tpu.memory_space<vmem>>) attributes {dimension_semantics = [#tpu.dimension_semantics<parallel>, #tpu.dimension_semantics<parallel>], iteration_bounds = array<i64: 1, 2>, scalar_prefetch = 0 : i64, scratch_operands = 0 : i64, tpu.core_type = #tpu.core_type<tc>, window_params = [{transform_indices = @transform_0, window_bounds = array<i64: 8, 256>}, {transform_indices = @transform_1, window_bounds = array<i64: 256, 256>}, {transform_indices = @transform_2, window_bounds = array<i64: 1, 256>}, {transform_indices = @transform_3, window_bounds = array<i64: 8, 256>}]} {
    %c0 = arith.constant 0 : index
    %c0_0 = arith.constant 0 : index
    %0 = vector.load %arg2[%c0, %c0_0] : memref<8x256xf32, #tpu.memory_space<vmem>>, vector<8x256xf32>
    %1 = arith.truncf %0 : vector<8x256xf32> to vector<8x256xbf16>
    %c0_1 = arith.constant 0 : index
    %c0_2 = arith.constant 0 : index
    %2 = vector.load %arg3[%c0_1, %c0_2] : memref<256x256xbf16, #tpu.memory_space<vmem>>, vector<256x256xbf16>
    %cst = arith.constant dense<0.000000e+00> : vector<8x256xf32>
    %3 = tpu.matmul %1, %2, %cst {dimension_numbers = #tpu.dot_dimension_numbers<[1], [0], [0], [1], [0, 0, 1, 1], [], []>} : vector<8x256xbf16>, vector<256x256xbf16>, vector<8x256xf32> -> vector<8x256xf32>
    %c0_3 = arith.constant 0 : index
    %c0_4 = arith.constant 0 : index
    %4 = vector.load %arg4[%c0_3, %c0_4] : memref<1x256xf32, #tpu.memory_space<vmem>>, vector<1x256xf32>
    %5 = vector.broadcast %4 : vector<1x256xf32> to vector<8x256xf32>
    %6 = arith.addf %3, %5 : vector<8x256xf32>
    %c0_5 = arith.constant 0 : index
    %c0_6 = arith.constant 0 : index
    %7 = vector.load %arg5[%c0_5, %c0_6] : memref<8x256xf32, #tpu.memory_space<vmem>>, vector<8x256xf32>
    tpu.vector_store %arg5[%c0_5, %c0_6], %6 {strides = array<i32>} : memref<8x256xf32, #tpu.memory_space<vmem>>, vector<8x256xf32>,
    return
  }
  func.func @transform_0(%arg0: i32, %arg1: i32) -> (i32, i32) {
    %c0_i32 = arith.constant 0 : i32
    %c0_i32_0 = arith.constant 0 : i32
    return %arg0, %c0_i32 : i32, i32
  }
  func.func @transform_1(%arg0: i32, %arg1: i32) -> (i32, i32) {
    %c0_i32 = arith.constant 0 : i32
    %c0_i32_0 = arith.constant 0 : i32
    return %c0_i32, %arg1 : i32, i32
  }
  func.func @transform_2(%arg0: i32, %arg1: i32) -> (i32, i32) {
    %c0_i32 = arith.constant 0 : i32
    %c0_i32_0 = arith.constant 0 : i32
    return %c0_i32, %arg1 : i32, i32
  }
  func.func @transform_3(%arg0: i32, %arg1: i32) -> (i32, i32) {
    %c0_i32 = arith.constant 0 : i32
    return %arg0, %arg1 : i32, i32
  }
}

</mosaic_0001>

<bundles_post_ra>
// kernel: tpu_custom_call.1
= control target key start
LH: loop header
LB: loop body
LE: loop exit
PB: predicated region body
PF: predicated region fallthrough
CT: control target
= control target key end

     0   :  { %8 = vsyncpa [#allocation3], 0  ;;  %s1223_s0 = inlined_call_operand.hbm [shape: f32[8,256], index: 0, kind: input, shape index: {}]   ;;  %s1224_s1 = inlined_call_operand.hbm [shape: bf16[256,512], index: 1, kind: input, shape index: {}]   ;;  %s1225_s2 = inlined_call_operand.vmem [shape: f32[1,512], index: 2, kind: input, shape index: {}]   ;;  %s1226_s3 = inlined_call_operand.hbm [shape: f32[8,512], index: 3, kind: output, shape index: {}]  }
   0x1   :  { %9 = vsyncpa [#allocation6], 0 }
   0x2   :  { %11 = vsyncpa [#allocation6 + $0x1], 0 }
   0x3   :  { %12 = vsyncpa [#allocation4], 0 }
   0x4   :  { %14 = vsyncpa [#allocation4 + $0x1], 0  ;;  %s965_s12 = smov 0   ;;  %s967_s13 = smov 0  }
   0x5   :  { %s969_s14 = smov 0   ;;  %s971_s15 = smov 0  }
   0x6   :  { %s973_s16 = smov 0   ;;  %s975_s17 = smov 0  }
   0x7 LB: > { %s617_s18 = sadd.s32 4294967295, %s937_s17   ;;  %s618_s19 = sadd.s32 4294967294, %s937_s17   ;;  %s937_s17 = sphi %s975_s17, %s20_s17   ;;  %s933_s16 = sphi %s973_s16, %s1254_s16   ;;  %s929_s15 = sphi %s971_s15, %s1253_s15   ;;  %s925_s14 = sphi %s969_s14, %s1252_s14   ;;  %s921_s13 = sphi %s967_s13, %s1251_s13   ;;  %s917_s12 = sphi %s965_s12, %s1250_s12  }
   0x8   : > { %s65_s20 = sadd.s32 1, %s925_s14  ;;  %p72_p0 = scmp.ne.s32.totalorder %s925_s14, %s921_s13 }
   0x9   : > { %p73_p1 = scmp.eq.s32.totalorder %s937_s17, 0  ;;  %p78_p2 = scmp.ne.s32.totalorder %s921_s13, %s917_s12 }
   0xa   : > { %p1003_p3 = scmp.eq.s32.totalorder %s617_s18, 0  ;;  %p130_p4 = scmp.eq.s32.totalorder %s617_s18, 1 }
   0xb   : > { %p1007_p5 = por %p73_p1, %p72_p0  ;;  %p136_p6 = scmp.eq.s32.totalorder %s618_s19, 1 }
   0xc   : > { %s1233_s21 = scalar_select %p1003_p3, 1, 0 }
   0xd   : > { %p1013_p7 = por %p1003_p3, %p78_p2  ;;  %p1017_p8 = por %p130_p4, %p72_p0 }
   0xe   : > { %p1021_p9 = por %p136_p6, %p78_p2  ;;  %p619_p10 = scmp.ge.s32.totalorder %s937_s17, 1 }
   0xf   : > { %s1235_s23 = scalar_select %p1013_p7, 1, 0 }
  0x10   : > { %s1236_s24 = scalar_select %p1017_p8, 1, 0 }
  0x11   : > { %s1237_s25 = scalar_select %p1021_p9, 1, 0 }
  0x12   : > { %p143_p11 = scmp.lt.s32.totalorder %s937_s17, 3  ;;  %s939_s27 = smov [#allocation2]  }
  0x13   : > { %s159_s28 = sshll.u32 %s939_s27, 4  ;;  %p690_p1 = scmp.lt.s32.totalorder %s937_s17, 2  ;;  %s160_s28 = int_to_ptr.vmem [resolvable:$true] %s159_s28 }
  0x14   : > { %p1028_p13 = pnand %p619_p10, %p143_p11  ;;  %s29_s4 = sadd.s32 1, %s933_s16 }
  0x15   : > { %p1037_p4 = pnand %p690_p1, %p1007_p5  ;;  %p1048_p6 = scmp.ge.s32.totalorder %s29_s4, 2 }
  0x16   : > { %s1238_s26 = scalar_select %p1028_p13, 1, 0 }
  0x17   : > { %p677_p0 = pneg %p1028_p13  ;;  %s170_s6 = sand.u32 1, %s925_s14  }
  0x18   : > { %s1239_s29 = scalar_select %p1037_p4, 1, 0 }
  0x19   : > { %p1043_p2 = pnand %p677_p0, %p1003_p3  ;;  %s793_s9 = scalar_lea.hbm %s1223_s0, 256 }
  0x1a   : > { %s1241_s5 = scalar_select %p1048_p6, 1, 0 }
  0x1b   : > { %p794_p5 = scmp.ne.s32.totalorder %s1223_s0, %s793_s9  ;;  %p795_p10 = pneg %p1043_p2 }
  0x1c   : > { %p800_p0 = scmp.lt.u32.totalorder %s793_s9, %s1223_s0 }
  0x1d   : > { %p796_p11 = pnand %p795_p10, %p794_p5 }
  0x1f   : > { %p797_p1 = pneg %p796_p11 }
  0x21   : > { %p802_p12 = pnand %p800_p0, %p797_p1 }
  0x23   : > { %805 = shalt.err (!%p802_p12)
}
  0x24   : > { %s806_s22 = scalar_lea.vmem %s160_s28, 256  ;;  %p814_p3 = scmp.lt.s32.totalorder %s160_s28, %s160_s28 }
  0x25   : > { %p807_p9 = scmp.ne.s32.totalorder %s160_s28, %s806_s22  ;;  %p815_p13 = scmp.lt.s32.totalorder %s806_s22, %s806_s22 }
  0x27   : > { %p809_p8 = pnand %p807_p9, %p795_p10  ;;  %p816_p4 = por %p815_p13, %p814_p3 }
  0x29   : > { %p810_p7 = pneg %p809_p8 }
  0x2b   : > { %p817_p6 = pnand %p816_p4, %p810_p7 }
  0x2d   : > { %820 = shalt.err (!%p817_p6)
}
  0x2e   : > { %680 = dma.hbm_to_vmem [thread:$0]  (!%p1043_p2), %s1223_s0, 256, %s160_s28, [#allocation3]  }
  0x2f   : > { %p1242_p9 = scmp.ne.s32.totalorder %s1241_s5, 0  ;;  %s622_s8 = sshll.u32 %s170_s6, 8 }
  0x30   : > { %s667_s10 = sshll.u32 %s933_s16, 7  ;;  %s174_s19 = scalar_lea.vmem [#allocation5], %s622_s8 }
  0x31   : > { %s1256_s4 = smov (%p1242_p9, %s29_s4), 0  ;;  %s1079_s18 = scalar_lea.hbm %s1224_s1, %s667_s10 }
  0x32   : > { %s62_s9 = ssub.s32 %s933_s16, %s1256_s4  ;;  %s181_s22 = sshll.u32 %s174_s19, 4  ;;  %s1086_s22 = int_to_ptr.vmem [resolvable:$true] %s181_s22 }
  0x33   : > { %p63_p3 = scmp.eq.s32.totalorder %s62_s9, 0  ;;  %s1088_s5 = scalar_lea.sflag [#allocation6], %s170_s6 }
  0x34   : > { %s821_s27 = scalar_lea.hbm %s1079_s18, 4096  ;;  %p1243_p8 = scmp.ne.s32.totalorder %s1239_s29, 0 }
  0x35   : > { %s1084_s28 = scalar_select %p63_p3, %s925_s14, %s65_s20  }
  0x36   : > { %p822_p7 = scmp.ne.s32.totalorder %s1079_s18, %s821_s27  ;;  %p823_p12 = pneg %p1243_p8 }
  0x37   : > { %s826_s8 = scalar_lea.hbm %s1224_s1, 8192  ;;  %p827_p2 = scmp.lt.u32.totalorder %s1079_s18, %s1224_s1 }
  0x38   : > { %p824_p13 = pnand %p823_p12, %p822_p7  ;;  %p828_p6 = scmp.lt.u32.totalorder %s826_s8, %s821_s27 }
  0x39   : > { %p830_p10 = scmp.lt.u32.totalorder %s821_s27, %s1079_s18 }
  0x3a   : > { %p825_p4 = pneg %p824_p13  ;;  %p829_p5 = por %p828_p6, %p827_p2 }
  0x3c   : > { %p831_p11 = por %p830_p10, %p829_p5 }
  0x3e   : > { %p832_p1 = pnand %p831_p11, %p825_p4 }
  0x40   : > { %835 = shalt.err (!%p832_p1)
}
  0x41   : > { %s836_s20 = scalar_lea.vmem %s1086_s22, 4096  ;;  %s940_s6 = smov [#allocation5]  }
  0x42   : > { %p837_p0 = scmp.ne.s32.totalorder %s1086_s22, %s836_s20  ;;  %s841_s11 = sshll.u32 %s940_s6, 4  ;;  %s842_s11 = int_to_ptr.vmem [resolvable:$false] %s841_s11 }
  0x43   : > { %s843_s19 = scalar_lea.vmem %s842_s11, 8192  ;;  %p844_p7 = scmp.lt.s32.totalorder %s1086_s22, %s842_s11 }
  0x44   : > { %p839_p9 = pnand %p837_p0, %p823_p12  ;;  %p845_p13 = scmp.lt.s32.totalorder %s843_s19, %s836_s20 }
  0x46   : > { %p840_p3 = pneg %p839_p9  ;;  %p846_p2 = por %p845_p13, %p844_p7 }
  0x48   : > { %p847_p6 = pnand %p846_p2, %p840_p3 }
  0x4a   : > { %850 = shalt.err (!%p847_p6)
}
  0x4b   : > { %s941_s27 = smov 256   ;;  %s942_s7 = smov 128  }
  0x4c   : > { %s943_s9 = smov 8   ;;  %p1244_p12 = scmp.ne.s32.totalorder %s1238_s26, 0 }
  0x4d   : > { %684 = dma.hbm_to_vmem [thread:$0]  (!%p1243_p8), %s1079_s18, 4096, %s1086_s22, %s1088_s5, %s941_s27, %s942_s7, %s943_s9  }
  0x4e   : > { %201 = sbr.rel (%p1244_p12) target bundleno = 384 (0x180), region = 32  ;;  %p1245_p4 = scmp.ne.s32.totalorder (!%p1244_p12), %s1233_s21, 0 }
  0x55   : > { %904 = dma.done.wait (%p1245_p4), [#allocation3], 256  }
  0x56   : > { %906 = vsyncadd (%p1245_p4), [#allocation3], 4294967040  ;;  %s1123_s8 = sand.u32 1, %s921_s13   ;;  %p1246_p8 = scmp.ne.s32.totalorder %s1235_s23, 0 }
  0x57   : > { %s627_s10 = sshll.u32 %s1123_s8, 8  ;;  %s208_s30 = scalar_lea.sflag [#allocation6], %s1123_s8 }
  0x58   : > { %s1127_s20 = scalar_lea.vmem [#allocation5], %s627_s10 }
  0x59   : > { %908 = dma.done.wait (%p1246_p8), %s208_s30, 4096  }
  0x5a   : > { %910 = vsyncadd (%p1246_p8), %s208_s30, 4294963200  ;;  %v745_v0 = vld [vmem:[%s1127_s20 + $0x4] ss:$8 sps:$4 sm:$0xff]   ;;  %v747_v1 = vld [vmem:[%s1127_s20] ss:$8 sps:$4 sm:$0xff]   ;;  %s629_s21 = sshll.u32 %s929_s15, 1  ;;  %v283_v36 = vlaneseq }
  0x5b   : > { %453 = vmatprep.subr.bf16.mxu0 %v745_v0  ;;  %v748_v2 = vld [vmem:[%s1127_s20 + $0x14] ss:$8 sps:$4 sm:$0xff]   ;;  %v750_v3 = vld [vmem:[%s1127_s20 + $0x10] ss:$8 sps:$4 sm:$0xff]   ;;  %v751_v4 = vld [vmem:[%s1127_s20 + $0x24] ss:$8 sps:$4 sm:$0xff]  }
  0x5c   : > { %454 = vmatpush1.bf16.msra.mxu0 %v747_v1  ;;  %v753_v5 = vld [vmem:[%s1127_s20 + $0x20] ss:$8 sps:$4 sm:$0xff]   ;;  %v754_v6 = vld [vmem:[%s1127_s20 + $0x34] ss:$8 sps:$4 sm:$0xff]   ;;  %v756_v7 = vld [vmem:[%s1127_s20 + $0x30] ss:$8 sps:$4 sm:$0xff]  }
  0x5d   : > { %455 = vmatprep.subr.bf16.mxu0 %v748_v2  ;;  %v757_v8 = vld [vmem:[%s1127_s20 + $0x44] ss:$8 sps:$4 sm:$0xff]   ;;  %v759_v9 = vld [vmem:[%s1127_s20 + $0x40] ss:$8 sps:$4 sm:$0xff]   ;;  %v760_v10 = vld [vmem:[%s1127_s20 + $0x54] ss:$8 sps:$4 sm:$0xff]  }
  0x5e   : > { %v762_v11 = vld [vmem:[%s1127_s20 + $0x50] ss:$8 sps:$4 sm:$0xff]   ;;  %v763_v12 = vld [vmem:[%s1127_s20 + $0x64] ss:$8 sps:$4 sm:$0xff]   ;;  %v765_v15 = vld [vmem:[%s1127_s20 + $0x60] ss:$8 sps:$4 sm:$0xff]  }
  0x5f   : > { %v246_v13 = vld [vmem:[#allocation2 + $0x8] sm:$0xff]  ;;  %v769_v18 = vld [vmem:[%s1127_s20 + $0x84] ss:$8 sps:$4 sm:$0xff]   ;;  %v771_v19 = vld [vmem:[%s1127_s20 + $0x80] ss:$8 sps:$4 sm:$0xff]   ;;  %p240_p5 = scmp.lt.s32.totalorder %s629_s21, 3 }
  0x60   : > { %456 = vmatpush1.bf16.msra.mxu0 %v750_v3  ;;  %v248_v14 = vpack.c.bf16 %v246_v13, %v246_v13  ;;  %v766_v16 = vld [vmem:[%s1127_s20 + $0x74] ss:$8 sps:$4 sm:$0xff]   ;;  %v768_v17 = vld [vmem:[%s1127_s20 + $0x70] ss:$8 sps:$4 sm:$0xff]   ;;  %v775_v22 = vld [vmem:[%s1127_s20 + $0xa4] ss:$8 sps:$4 sm:$0xff]  }
  0x61   : > { %457 = vmatprep.subr.bf16.mxu0 %v751_v4  ;;  %v772_v20 = vld [vmem:[%s1127_s20 + $0x94] ss:$8 sps:$4 sm:$0xff]   ;;  %v774_v21 = vld [vmem:[%s1127_s20 + $0x90] ss:$8 sps:$4 sm:$0xff]   ;;  %v777_v23 = vld [vmem:[%s1127_s20 + $0xa0] ss:$8 sps:$4 sm:$0xff]  }
  0x62   : > { %485 = vmatprep.mubr.bf16.mxu0 %v248_v14  ;;  %v778_v24 = vld [vmem:[%s1127_s20 + $0xb4] ss:$8 sps:$4 sm:$0xff]   ;;  %v780_v25 = vld [vmem:[%s1127_s20 + $0xb0] ss:$8 sps:$4 sm:$0xff]   ;;  %v781_v26 = vld [vmem:[%s1127_s20 + $0xc4] ss:$8 sps:$4 sm:$0xff]  }
  0x63   : > { %v783_v27 = vld [vmem:[%s1127_s20 + $0xc0] ss:$8 sps:$4 sm:$0xff]   ;;  %v784_v28 = vld [vmem:[%s1127_s20 + $0xd4] ss:$8 sps:$4 sm:$0xff]   ;;  %v786_v29 = vld [vmem:[%s1127_s20 + $0xd0] ss:$8 sps:$4 sm:$0xff]  }
  0x64   : > { %458 = vmatpush1.bf16.msra.mxu0 %v753_v5  ;;  %v787_v30 = vld [vmem:[%s1127_s20 + $0xe4] ss:$8 sps:$4 sm:$0xff]   ;;  %v789_v31 = vld [vmem:[%s1127_s20 + $0xe0] ss:$8 sps:$4 sm:$0xff]   ;;  %v790_v32 = vld [vmem:[%s1127_s20 + $0xf4] ss:$8 sps:$4 sm:$0xff]  }
  0x65   : > { %459 = vmatprep.subr.bf16.mxu0 %v754_v6  ;;  %v792_v33 = vld [vmem:[%s1127_s20 + $0xf0] ss:$8 sps:$4 sm:$0xff]   ;;  %s1258_s21 = smov (!%p240_p5, %s629_s21), 3  ;;  %v284_v37 = vshrl.u32 %v283_v36, 7  ;;  %s628_s18 = sshll.u32 %s1123_s8, 4 }
  0x66   : > { %v245_v34 = vld [vmem:[#allocation2] sm:$0xff]  ;;  %s242_s29 = scalar_lea.vmem %s1225_s2, %s1258_s21  ;;  %s668_s22 = sshll.u32 %s929_s15, 8 }
  0x67   : > { %v247_v35 = vpack.c.bf16 %v245_v34, %v245_v34  ;;  %v285_v38 = vsub.s32 0, %v284_v37  ;;  %v281_v39 = vld [vmem:[%s242_s29] sm:$0x3]  ;;  %v289_v40 = vsub.s32 1, %v284_v37  ;;  %s237_s5 = scalar_lea.vmem [#allocation7], %s628_s18  ;;  %s1174_s27 = scalar_lea.hbm %s1226_s3, %s668_s22 }
  0x68   : > { %460 = vmatpush1.bf16.msra.mxu0 %v756_v7  ;;  %s513_s6 = sshll.u32 %s237_s5, 4  ;;  %s497_s15 = scalar_lea.sflag [#allocation4], %s1123_s8  ;;  %s1176_s6 = int_to_ptr.vmem [resolvable:$true] %s513_s6 }
  0x69   : > { %461 = vmatprep.subr.bf16.mxu0 %v757_v8  ;;  %v286_v41 = vrot.slane %v281_v39, %v285_v38  ;;  %v290_v42 = vrot.slane %v281_v39, %v289_v40  ;;  %s851_s7 = scalar_lea.vmem %s1176_s6, 256  ;;  %p1247_p11 = scmp.ne.s32.totalorder %s1236_s24, 0 }
  0x6a   : > { %p852_p10 = scmp.ne.s32.totalorder %s1176_s6, %s851_s7  ;;  %s944_s9 = smov [#allocation7]  }
  0x6b   : > { %s855_s10 = sshll.u32 %s944_s9, 4  ;;  %s856_s10 = int_to_ptr.vmem [resolvable:$false] %s855_s10 }
  0x6c   : > { %462 = vmatpush1.bf16.msra.mxu0 %v759_v9  ;;  %p853_p1 = pnand %p852_p10, %p1247_p11  ;;  %s857_s30 = scalar_lea.vmem %s856_s10, 512 }
  0x6d   : > { %463 = vmatprep.subr.bf16.mxu0 %v760_v10  ;;  %p858_p9 = scmp.lt.s32.totalorder %s1176_s6, %s856_s10  ;;  %p859_p3 = scmp.lt.s32.totalorder %s857_s30, %s851_s7 }
  0x6e   : > { %p854_p0 = pneg %p853_p1 }
  0x6f   : > { %p860_p7 = por %p859_p3, %p858_p9 }
  0x70   : > { %464 = vmatpush1.bf16.msra.mxu0 %v762_v11 }
  0x71   : > { %465 = vmatprep.subr.bf16.mxu0 %v763_v12  ;;  %p861_p13 = pnand %p860_p7, %p854_p0 }
  0x74   : > { %466 = vmatpush1.bf16.msra.mxu0 %v765_v15 }
  0x75   : > { %467 = vmatprep.subr.bf16.mxu0 %v766_v16 }
  0x78   : > { %468 = vmatpush1.bf16.msra.mxu0 %v768_v17 }
  0x79   : > { %469 = vmatprep.subr.bf16.mxu0 %v769_v18 }
  0x7c   : > { %470 = vmatpush1.bf16.msra.mxu0 %v771_v19 }
  0x7d   : > { %471 = vmatprep.subr.bf16.mxu0 %v772_v20 }
  0x80   : > { %472 = vmatpush1.bf16.msra.mxu0 %v774_v21 }
  0x81   : > { %473 = vmatprep.subr.bf16.mxu0 %v775_v22 }
  0x84   : > { %474 = vmatpush1.bf16.msra.mxu0 %v777_v23 }
  0x85   : > { %475 = vmatprep.subr.bf16.mxu0 %v778_v24 }
  0x88   : > { %476 = vmatpush1.bf16.msra.mxu0 %v780_v25 }
  0x89   : > { %477 = vmatprep.subr.bf16.mxu0 %v781_v26 }
  0x8c   : > { %478 = vmatpush1.bf16.msra.mxu0 %v783_v27 }
  0x8d   : > { %479 = vmatprep.subr.bf16.mxu0 %v784_v28 }
  0x90   : > { %480 = vmatpush1.bf16.msra.mxu0 %v786_v29 }
  0x91   : > { %481 = vmatprep.subr.bf16.mxu0 %v787_v30 }
  0x94   : > { %482 = vmatpush1.bf16.msra.mxu0 %v789_v31 }
  0x95   : > { %483 = vmatprep.subr.bf16.mxu0 %v790_v32 }
  0x98   : > { %484 = vmatpush1.bf16.msra.mxu0 %v792_v33 }
  0x9b   : > { %486 = vmatmul.mubr.bf16.vlgmr.msra.gmra.mrb[0].mxu0 %v247_v35 }
 0x16e   : > { %v487_v43 = vpop.f32.mrb[0].mxu0 }
 0x16f   : > { %v488_v44 = vadd.f32 %v487_v43, %v286_v41  ;;  %v489_v45 = vpop.f32.mrb[1].mxu0 }
 0x170   : > { %v490_v46 = vadd.f32 %v489_v45, %v290_v42  ;;  %v491_v47 = vpop.f32.mrb[2].mxu0 }
 0x171   : > { %494 = vst [vmem:[%s237_s5] sm:$0xff] %v488_v44  ;;  %v492_v48 = vpop.f32.mrb[3].mxu0 }
 0x172   : > { %495 = vst [vmem:[%s237_s5 + $0x8] sm:$0xff] %v490_v46 }
 0x173   : > { %864 = shalt.err (!%p861_p13)
}
 0x174   : > { %s865_s8 = scalar_lea.hbm %s1174_s27, 256  ;;  %s869_s23 = scalar_lea.hbm %s1226_s3, 512 }
 0x175   : > { %p866_p2 = scmp.ne.s32.totalorder %s1174_s27, %s865_s8  ;;  %p870_p4 = scmp.lt.u32.totalorder %s1174_s27, %s1226_s3 }
 0x176   : > { %p871_p8 = scmp.lt.u32.totalorder %s869_s23, %s865_s8  ;;  %p873_p10 = scmp.lt.u32.totalorder %s865_s8, %s1174_s27 }
 0x177   : > { %p867_p6 = pnand %p866_p2, %p1247_p11 }
 0x178   : > { %p872_p5 = por %p871_p8, %p870_p4 }
 0x179   : > { %p868_p12 = pneg %p867_p6 }
 0x17a   : > { %p874_p1 = por %p873_p10, %p872_p5 }
 0x17c   : > { %p875_p0 = pnand %p874_p1, %p868_p12 }
 0x17e   : > { %878 = shalt.err (!%p875_p0)
}
 0x17f   : > { %675 = dma.vmem_to_hbm [thread:$0]  (%p1247_p11), %s1176_s6, 256, %s1174_s27, %s497_s15  }
 0x180 PF: > { %s525_s18 = sand.u32 1, %s917_s12   ;;  %p1248_p9 = scmp.ne.s32.totalorder %s1237_s25, 0 }
 0x181   : > { %p1249_p3 = scmp.ge.s32.totalorder %s937_s17, 2  ;;  %s526_s22 = scalar_lea.sflag [#allocation4], %s525_s18 }
 0x183   : > { %p686_p7 = pnand %p1249_p3, %p1248_p9 }
 0x185   : > { %912 = dma.done.wait (!%p686_p7), %s526_s22, 256  }
 0x186   : > { %914 = vsyncadd (!%p686_p7), %s526_s22, 4294967040  ;;  %s20_s17 = sadd.s32 1, %s937_s17   ;;  %s1250_s12 = smov %s921_s13 }
 0x187   : > { %p17_p13 = scmp.ge.s32.totalorder %s20_s17, 4   ;;  %s1251_s13 = smov %s925_s14 }
 0x188   : > { %s1252_s14 = smov %s1084_s28  ;;  %s1253_s15 = smov %s933_s16 }
 0x189   : > { %s1254_s16 = smov %s1256_s4  ;;  %19 = sbr.rel (!%p17_p13) target bundleno = 7 (0x7), region = 86 }
 0x190   :  { %531 = vsyncpa [#allocation3], 1 }
 0x191   :  { %533 = vsyncpa [#allocation3 + $0x1], 1 }
 0x192   :  { %534 = vsyncpa [#allocation6], 1 }
 0x193   :  { %536 = vsyncpa [#allocation6 + $0x1], 1 }
 0x194   :  { %537 = vsyncpa [#allocation4], 1 }
 0x195   :  { %539 = vsyncpa [#allocation4 + $0x1], 1 }

</bundles_post_ra>
